<compile_context>
chip_gen: v6e
topology: v6e:2x2x1
jax: 0.10.0
libtpu: 0.0.40
codegen_flags: <defaults>
</compile_context>

<pallas_src>
import functools

import numpy as np
import jax
import jax.numpy as jnp
from jax.experimental import pallas as pl
from jax.experimental.pallas import tpu as pltpu


def _table_feat_kernel(card_ref, x_ref, w1_ref, b1_ref, w2_ref, b2_ref,
                       w3_ref, o_ref):
    # Per-row log-cardinality feature (EUP log -> separate VLIW slot, ~free).
    c = jnp.log(card_ref[...] + 1.0) - 9.0                        # (TB, 1)

    x = x_ref[...]                                                # (TB, n_tables)

    # fc1 + ReLU; weights zero-padded so output lane `hidden-1` is exactly 0.
    h = jnp.dot(x, w1_ref[...], preferred_element_type=jnp.float32) + b1_ref[...]
    h = jnp.maximum(h, 0.0)                                       # (TB, hidden)

    # torch.cat([h, c], dim=1) folded: overwrite the (zero) last lane with c.
    lane = jax.lax.broadcasted_iota(jnp.int32, h.shape, dimension=1)
    last = h.shape[-1] - 1
    h = jnp.where(lane == last, c, h)

    # fc2 + ReLU (also zero-padded), then fold c into the last lane again.
    h = jnp.dot(h, w2_ref[...], preferred_element_type=jnp.float32) + b2_ref[...]
    h = jnp.maximum(h, 0.0)
    h = jnp.where(lane == last, c, h)

    # fc3 (no bias).
    o_ref[...] = jnp.dot(h, w3_ref[...], preferred_element_type=jnp.float32)


def prepare_params(params):
    """One-time weight prep (hoisted out of the per-call path).

    Zero-pads fc1/fc2 from hidden-1 -> hidden output lanes (so the appended
    scalar c can be folded into the last activation lane) and reshapes biases
    to (1, hidden) rows.
    """
    hidden = params["w3"].shape[1]
    return {
        "w1": jnp.pad(params["w1"], ((0, 0), (0, 1))),            # (n_tables, hidden)
        "b1": jnp.pad(params["b1"], ((0, 1),)).reshape(1, hidden),
        "w2": jnp.pad(params["w2"], ((0, 0), (0, 1))),            # (hidden, hidden)
        "b2": jnp.pad(params["b2"], ((0, 1),)).reshape(1, hidden),
        "w3": params["w3"],                                        # (hidden, hidden)
    }


@functools.partial(jax.jit, static_argnames=("block_rows",))
def table_feature_extractor(one_hot_table, cardinality, prepared, block_rows=128):
    """Batched forward.

    one_hot_table: (B, n_tables) float
    cardinality:   scalar or (B,) float (per-row table cardinality)
    prepared:      output of prepare_params()
    returns:       (B, hidden) float32
    """
    x = jnp.asarray(one_hot_table, jnp.float32)
    batch, n_tables = x.shape
    hidden = prepared["w3"].shape[1]

    card = jnp.broadcast_to(
        jnp.asarray(cardinality, jnp.float32).reshape(-1), (batch,)
    ).reshape(batch, 1)

    # Row tile: multiple of 8 sublanes, capped at block_rows; pad batch to fit.
    tb = min(block_rows, ((batch + 7) // 8) * 8)
    b_pad = ((batch + tb - 1) // tb) * tb
    if b_pad != batch:
        x = jnp.pad(x, ((0, b_pad - batch), (0, 0)))
        card = jnp.pad(card, ((0, b_pad - batch), (0, 0)))

    def weight_spec(arr):
        return pl.BlockSpec(arr.shape, lambda i: (0, 0))          # resident weights

    out = pl.pallas_call(
        _table_feat_kernel,
        out_shape=jax.ShapeDtypeStruct((b_pad, hidden), jnp.float32),
        grid=(b_pad // tb,),
        in_specs=[
            pl.BlockSpec((tb, 1), lambda i: (i, 0)),              # cardinality rows
            pl.BlockSpec((tb, n_tables), lambda i: (i, 0)),       # one-hot rows
            weight_spec(prepared["w1"]),
            weight_spec(prepared["b1"]),
            weight_spec(prepared["w2"]),
            weight_spec(prepared["b2"]),
            weight_spec(prepared["w3"]),
        ],
        out_specs=pl.BlockSpec((tb, hidden), lambda i: (i, 0)),
        compiler_params=pltpu.CompilerParams(
            dimension_semantics=("parallel",)),
    )(card, x, prepared["w1"], prepared["b1"], prepared["w2"],
      prepared["b2"], prepared["w3"])

    return out[:batch]


def init_params(n_tables=21, hidden_size=64, seed=0):
    """Deterministic init matching weights_init (uniform(-w_bound, w_bound), bias=0).

    Weights are stored as (in, out), i.e. the transpose of torch's (out, in).
    """
    key = jax.random.PRNGKey(seed)
    k1, k2, k3 = jax.random.split(key, 3)

    def w_bound(fan_in, fan_out):
        return float(np.sqrt(6.0 / (fan_in + fan_out)))

    b1v = w_bound(n_tables, hidden_size - 1)
    b2v = w_bound(hidden_size, hidden_size - 1)
    b3v = w_bound(hidden_size, hidden_size)

    w1 = jax.random.uniform(k1, (n_tables, hidden_size - 1), jnp.float32, -b1v, b1v)
    w2 = jax.random.uniform(k2, (hidden_size, hidden_size - 1), jnp.float32, -b2v, b2v)
    w3 = jax.random.uniform(k3, (hidden_size, hidden_size), jnp.float32, -b3v, b3v)
    return {
        "w1": w1, "b1": jnp.zeros((hidden_size - 1,), jnp.float32),
        "w2": w2, "b2": jnp.zeros((hidden_size - 1,), jnp.float32),
        "w3": w3,
    }


def _reference(one_hot_table, cardinality, params):
    """Pure-JAX reference matching the PyTorch forward row-by-row."""
    x = jnp.asarray(one_hot_table, jnp.float32)
    card = np.asarray(cardinality, np.float64).reshape(-1)
    c = jnp.asarray((np.log(card + 1.0) - 9.0).astype(np.float32)).reshape(-1, 1)
    c = jnp.broadcast_to(c, (x.shape[0], 1))
    h = jnp.maximum(x @ params["w1"] + params["b1"], 0.0)
    h = jnp.concatenate([h, c], axis=1)
    h = jnp.maximum(h @ params["w2"] + params["b2"], 0.0)
    h = jnp.concatenate([h, c], axis=1)
    return h @ params["w3"]


if __name__ == "__main__":
    n_tables, hidden_size, batch = 21, 64, 8
    params = init_params(n_tables, hidden_size, seed=0)
    prepared = prepare_params(params)

    key = jax.random.PRNGKey(0)
    k_idx, k_card = jax.random.split(key)
    table_idx = jax.random.randint(k_idx, (batch,), 0, n_tables)
    one_hot = jax.nn.one_hot(table_idx, n_tables, dtype=jnp.float32)
    cardinality = jax.random.uniform(k_card, (batch,), jnp.float32,
                                     minval=10.0, maxval=1.0e6)

    out = table_feature_extractor(one_hot, cardinality, prepared)
    out = jax.block_until_ready(out)

    ref = _reference(one_hot, cardinality, params)
    assert out.shape == (batch, hidden_size)
    np.testing.assert_allclose(np.asarray(out), np.asarray(ref),
                               rtol=2e-5, atol=2e-5)
    print("KERNEL_OK")
</pallas_src>

<mosaic_0001>
module attributes {stable_mosaic.version = 11 : i64} {
  func.func @_table_feat_kernel(%arg0: i32, %arg1: memref<8x1xf32, #tpu.memory_space<vmem>>, %arg2: memref<8x21xf32, #tpu.memory_space<vmem>>, %arg3: memref<21x64xf32, #tpu.memory_space<vmem>>, %arg4: memref<1x64xf32, #tpu.memory_space<vmem>>, %arg5: memref<64x64xf32, #tpu.memory_space<vmem>>, %arg6: memref<1x64xf32, #tpu.memory_space<vmem>>, %arg7: memref<64x64xf32, #tpu.memory_space<vmem>>, %arg8: memref<8x64xf32, #tpu.memory_space<vmem>>) attributes {dimension_semantics = [#tpu.dimension_semantics<parallel>], iteration_bounds = array<i64: 1>, scalar_prefetch = 0 : i64, scratch_operands = 0 : i64, tpu.core_type = #tpu.core_type<tc>, window_params = [{transform_indices = @transform_0, window_bounds = array<i64: 8, 1>}, {transform_indices = @transform_1, window_bounds = array<i64: 8, 21>}, {pipeline_mode = #tpu.pipeline_mode<synchronous>, transform_indices = @transform_2, window_bounds = array<i64: 21, 64>}, {pipeline_mode = #tpu.pipeline_mode<synchronous>, transform_indices = @transform_3, window_bounds = array<i64: 1, 64>}, {pipeline_mode = #tpu.pipeline_mode<synchronous>, transform_indices = @transform_4, window_bounds = array<i64: 64, 64>}, {pipeline_mode = #tpu.pipeline_mode<synchronous>, transform_indices = @transform_5, window_bounds = array<i64: 1, 64>}, {pipeline_mode = #tpu.pipeline_mode<synchronous>, transform_indices = @transform_6, window_bounds = array<i64: 64, 64>}, {transform_indices = @transform_7, window_bounds = array<i64: 8, 64>}]} {
    %c0 = arith.constant 0 : index
    %c0_0 = arith.constant 0 : index
    %0 = vector.load %arg1[%c0, %c0_0] : memref<8x1xf32, #tpu.memory_space<vmem>>, vector<8x1xf32>
    %cst = arith.constant 1.000000e+00 : f32
    %1 = vector.broadcast %cst : f32 to vector<8x1xf32>
    %2 = arith.addf %0, %1 : vector<8x1xf32>
    %3 = math.log %2 : vector<8x1xf32>
    %cst_1 = arith.constant 9.000000e+00 : f32
    %4 = vector.broadcast %cst_1 : f32 to vector<8x1xf32>
    %5 = arith.subf %3, %4 : vector<8x1xf32>
    %c0_2 = arith.constant 0 : index
    %c0_3 = arith.constant 0 : index
    %6 = vector.load %arg2[%c0_2, %c0_3] : memref<8x21xf32, #tpu.memory_space<vmem>>, vector<8x21xf32>
    %c0_4 = arith.constant 0 : index
    %c0_5 = arith.constant 0 : index
    %7 = vector.load %arg3[%c0_4, %c0_5] : memref<21x64xf32, #tpu.memory_space<vmem>>, vector<21x64xf32>
    %cst_6 = arith.constant dense<0.000000e+00> : vector<8x64xf32>
    %8 = tpu.matmul %6, %7, %cst_6 {dimension_numbers = #tpu.dot_dimension_numbers<[1], [0], [0], [1], [0, 0, 1, 1], [], []>} : vector<8x21xf32>, vector<21x64xf32>, vector<8x64xf32> -> vector<8x64xf32>
    %c0_7 = arith.constant 0 : index
    %c0_8 = arith.constant 0 : index
    %9 = vector.load %arg4[%c0_7, %c0_8] : memref<1x64xf32, #tpu.memory_space<vmem>>, vector<1x64xf32>
    %10 = vector.broadcast %9 : vector<1x64xf32> to vector<8x64xf32>
    %11 = arith.addf %8, %10 : vector<8x64xf32>
    %cst_9 = arith.constant 0.000000e+00 : f32
    %12 = vector.broadcast %cst_9 : f32 to vector<8x64xf32>
    %13 = arith.maximumf %11, %12 : vector<8x64xf32>
    %14 = tpu.iota {dimensions = array<i32: 1>} : vector<8x64xi32>
    %c63_i32 = arith.constant 63 : i32
    %15 = vector.broadcast %c63_i32 : i32 to vector<8x64xi32>
    %16 = arith.cmpi eq, %14, %15 : vector<8x64xi32>
    %17 = vector.shape_cast %5 : vector<8x1xf32> to vector<8x1xf32>
    %18 = vector.broadcast %17 : vector<8x1xf32> to vector<8x64xf32>
    %19 = arith.select %16, %18, %13 : vector<8x64xi1>, vector<8x64xf32>
    %c0_10 = arith.constant 0 : index
    %c0_11 = arith.constant 0 : index
    %20 = vector.load %arg5[%c0_10, %c0_11] : memref<64x64xf32, #tpu.memory_space<vmem>>, vector<64x64xf32>
    %cst_12 = arith.constant dense<0.000000e+00> : vector<8x64xf32>
    %21 = tpu.matmul %19, %20, %cst_12 {dimension_numbers = #tpu.dot_dimension_numbers<[1], [0], [0], [1], [0, 0, 1, 1], [], []>} : vector<8x64xf32>, vector<64x64xf32>, vector<8x64xf32> -> vector<8x64xf32>
    %c0_13 = arith.constant 0 : index
    %c0_14 = arith.constant 0 : index
    %22 = vector.load %arg6[%c0_13, %c0_14] : memref<1x64xf32, #tpu.memory_space<vmem>>, vector<1x64xf32>
    %23 = vector.broadcast %22 : vector<1x64xf32> to vector<8x64xf32>
    %24 = arith.addf %21, %23 : vector<8x64xf32>
    %cst_15 = arith.constant 0.000000e+00 : f32
    %25 = vector.broadcast %cst_15 : f32 to vector<8x64xf32>
    %26 = arith.maximumf %24, %25 : vector<8x64xf32>
    %c63_i32_16 = arith.constant 63 : i32
    %27 = vector.broadcast %c63_i32_16 : i32 to vector<8x64xi32>
    %28 = arith.cmpi eq, %14, %27 : vector<8x64xi32>
    %29 = vector.shape_cast %5 : vector<8x1xf32> to vector<8x1xf32>
    %30 = vector.broadcast %29 : vector<8x1xf32> to vector<8x64xf32>
    %31 = arith.select %28, %30, %26 : vector<8x64xi1>, vector<8x64xf32>
    %c0_17 = arith.constant 0 : index
    %c0_18 = arith.constant 0 : index
    %32 = vector.load %arg7[%c0_17, %c0_18] : memref<64x64xf32, #tpu.memory_space<vmem>>, vector<64x64xf32>
    %cst_19 = arith.constant dense<0.000000e+00> : vector<8x64xf32>
    %33 = tpu.matmul %31, %32, %cst_19 {dimension_numbers = #tpu.dot_dimension_numbers<[1], [0], [0], [1], [0, 0, 1, 1], [], []>} : vector<8x64xf32>, vector<64x64xf32>, vector<8x64xf32> -> vector<8x64xf32>
    %c0_20 = arith.constant 0 : index
    %c0_21 = arith.constant 0 : index
    %34 = vector.load %arg8[%c0_20, %c0_21] : memref<8x64xf32, #tpu.memory_space<vmem>>, vector<8x64xf32>
    tpu.vector_store %arg8[%c0_20, %c0_21], %33 {strides = array<i32>} : memref<8x64xf32, #tpu.memory_space<vmem>>, vector<8x64xf32>,
    return
  }
  func.func @transform_0(%arg0: i32) -> (i32, i32) {
    %c0_i32 = arith.constant 0 : i32
    %c0_i32_0 = arith.constant 0 : i32
    return %arg0, %c0_i32 : i32, i32
  }
  func.func @transform_1(%arg0: i32) -> (i32, i32) {
    %c0_i32 = arith.constant 0 : i32
    %c0_i32_0 = arith.constant 0 : i32
    return %arg0, %c0_i32 : i32, i32
  }
  func.func @transform_2(%arg0: i32) -> (i32, i32) {
    %c0_i32 = arith.constant 0 : i32
    %c0_i32_0 = arith.constant 0 : i32
    %c0_i32_1 = arith.constant 0 : i32
    return %c0_i32, %c0_i32_0 : i32, i32
  }
  func.func @transform_3(%arg0: i32) -> (i32, i32) {
    %c0_i32 = arith.constant 0 : i32
    %c0_i32_0 = arith.constant 0 : i32
    %c0_i32_1 = arith.constant 0 : i32
    return %c0_i32, %c0_i32_0 : i32, i32
  }
  func.func @transform_4(%arg0: i32) -> (i32, i32) {
    %c0_i32 = arith.constant 0 : i32
    %c0_i32_0 = arith.constant 0 : i32
    %c0_i32_1 = arith.constant 0 : i32
    return %c0_i32, %c0_i32_0 : i32, i32
  }
  func.func @transform_5(%arg0: i32) -> (i32, i32) {
    %c0_i32 = arith.constant 0 : i32
    %c0_i32_0 = arith.constant 0 : i32
    %c0_i32_1 = arith.constant 0 : i32
    return %c0_i32, %c0_i32_0 : i32, i32
  }
  func.func @transform_6(%arg0: i32) -> (i32, i32) {
    %c0_i32 = arith.constant 0 : i32
    %c0_i32_0 = arith.constant 0 : i32
    %c0_i32_1 = arith.constant 0 : i32
    return %c0_i32, %c0_i32_0 : i32, i32
  }
  func.func @transform_7(%arg0: i32) -> (i32, i32) {
    %c0_i32 = arith.constant 0 : i32
    %c0_i32_0 = arith.constant 0 : i32
    return %arg0, %c0_i32 : i32, i32
  }
}

</mosaic_0001>

<bundles_post_ra>
// kernel: table_feature_extractor.1
= control target key start
LH: loop header
LB: loop body
LE: loop exit
PB: predicated region body
PF: predicated region fallthrough
CT: control target
= control target key end

     0   :  { %12 = vsyncpa [#allocation3], 0  ;;  %s638_s0 = inlined_call_operand.vmem [shape: f32[8,1], index: 0, kind: input, shape index: {}]   ;;  %s639_s1 = inlined_call_operand.vmem [shape: f32[8,21], index: 1, kind: input, shape index: {}]   ;;  %s640_s2 = inlined_call_operand.hbm [shape: f32[21,64], index: 2, kind: input, shape index: {}]   ;;  %s641_s3 = inlined_call_operand.vmem [shape: f32[1,64], index: 3, kind: input, shape index: {}]   ;;  %s642_s4 = inlined_call_operand.hbm [shape: f32[64,64], index: 4, kind: input, shape index: {}]   ;;  %s643_s5 = inlined_call_operand.vmem [shape: f32[1,64], index: 5, kind: input, shape index: {}]   ;;  %s644_s6 = inlined_call_operand.hbm [shape: f32[64,64], index: 6, kind: input, shape index: {}]   ;;  %s645_s7 = inlined_call_operand.hbm [shape: f32[8,64], index: 7, kind: output, shape index: {}]  }
   0x1   :  { %13 = vsyncpa [#allocation6], 0 }
   0x2   :  { %14 = vsyncpa [#allocation4], 0  ;;  %s535_s24 = smov [#allocation5]   ;;  %s536_s26 = smov [#allocation2]  }
   0x3   :  { %s38_s25 = sshll.u32 %s535_s24, 4  ;;  %s24_s27 = sshll.u32 %s536_s26, 4  ;;  %s39_s25 = int_to_ptr.vmem [resolvable:$true] %s38_s25  ;;  %s25_s27 = int_to_ptr.vmem [resolvable:$true] %s24_s27 }
   0x4   :  { %s457_s28 = scalar_lea.vmem %s39_s25, 1024  ;;  %p462_p1 = scmp.lt.s32.totalorder %s39_s25, %s39_s25 }
   0x5   :  { %p458_p0 = scmp.ne.s32.totalorder %s39_s25, %s457_s28  ;;  %p463_p2 = scmp.lt.s32.totalorder %s457_s28, %s457_s28 }
   0x7   :  { %p464_p3 = por %p463_p2, %p462_p1 }
   0x9   :  { %p465_p4 = pnand %p464_p3, %p458_p0 }
   0xb   :  { %468 = shalt.err (!%p465_p4)
}
   0xc   :  { %s537_s29 = smov 128   ;;  %s538_s30 = smov 8  }
   0xd   :  { %44 = dma.hbm_to_vmem [thread:$0]  %s642_s4, 1024, %s39_s25, [#allocation6], %s537_s29, %s537_s29, %s538_s30  }
   0xe   :  { %s477_s10 = scalar_lea.vmem %s25_s27, 384  ;;  %p482_p6 = scmp.lt.s32.totalorder %s25_s27, %s25_s27 }
   0xf   :  { %p478_p5 = scmp.ne.s32.totalorder %s25_s27, %s477_s10  ;;  %p483_p7 = scmp.lt.s32.totalorder %s477_s10, %s477_s10 }
  0x11   :  { %p484_p8 = por %p483_p7, %p482_p6 }
  0x13   :  { %p485_p9 = pnand %p484_p8, %p478_p5 }
  0x15   :  { %488 = shalt.err (!%p485_p9)
}
  0x16   :  { %30 = dma.hbm_to_vmem [thread:$0]  %s640_s2, 384, %s25_s27, [#allocation3], %s537_s29, %s537_s29, %s538_s30  }
  0x17   :  { %s539_s13 = smov [#allocation7]  }
  0x18   :  { %s52_s14 = sshll.u32 %s539_s13, 4  ;;  %s53_s14 = int_to_ptr.vmem [resolvable:$true] %s52_s14 }
  0x19   :  { %s497_s15 = scalar_lea.vmem %s53_s14, 1024  ;;  %p502_p11 = scmp.lt.s32.totalorder %s53_s14, %s53_s14 }
  0x1a   :  { %p498_p10 = scmp.ne.s32.totalorder %s53_s14, %s497_s15  ;;  %p503_p12 = scmp.lt.s32.totalorder %s497_s15, %s497_s15 }
  0x1c   :  { %p504_p13 = por %p503_p12, %p502_p11 }
  0x1e   :  { %p505_p0 = pnand %p504_p13, %p498_p10 }
  0x20   :  { %508 = shalt.err (!%p505_p0)
}
  0x21   :  { %58 = dma.hbm_to_vmem [thread:$0]  %s644_s6, 1024, %s53_s14, [#allocation6], %s537_s29, %s537_s29, %s538_s30  }
  0x22   :  { %529 = dma.done.wait [#allocation3], 384  }
  0x23   :  { %530 = vsyncadd [#allocation3], 4294966912 }
  0x24   :  { %531 = dma.done.wait [#allocation6], 2048  }
  0x25   :  { %532 = vsyncadd [#allocation6], 4294965248  ;;  %v540_v0 = vmov 0.0   ;;  %vm541_vm0 = vmmov 0   ;;  %v542_v1 = vmov 0   ;;  %vm88_vm1 = vcmask 1044480  }
  0x26   :  { %390 = vmatprep.subr.mxu0 %v540_v0  ;;  %396 = vmatprep.mubr.msk.f32.mxu0 %vm541_vm0, %v540_v0  ;;  %v76_v2 = vld [vmem:[#allocation2 + $0x10] sm:$0x1f]  ;;  %v75_v3 = vld [vmem:[#allocation2 + $0x8] sm:$0xff]  ;;  %v68_v4 = vld [vmem:[%s638_s0] sm:$0xff]  ;;  %vm84_vm2 = vcmask 171008   ;;  %v163_v24 = vlaneseq  ;;  %vm187_vm4 = vcmask 523264  }
  0x27   :  { %446 = vset.pattern.permute.xlu0 %v542_v1  ;;  %399 = vmatprep.subr.mxu1 %v540_v0  ;;  %v179_v5 = vld [vmem:[#allocation5 + $0x38] sm:$0xff]  ;;  %v74_v6 = vld [vmem:[#allocation2] sm:$0xff]  ;;  %v69_v7 = vadd.f32 1.0, %v68_v4  ;;  %v178_v8 = vld [vmem:[#allocation5 + $0x30] sm:$0xff]  ;;  %s543_s20 = smov [#allocation8]  }
  0x28   :  { %415 = vmatprep.mubr.msk.f32.mxu1 %vm541_vm0, %v540_v0  ;;  %391 = vmatpush3.msk.msra.mxu0 %vm88_vm1, %v76_v2  ;;  %v73_v9 = vld [vmem:[%s639_s1] sm:$0xff]  ;;  %v176_v11 = vld [vmem:[#allocation5 + $0x20] sm:$0xff]  ;;  %v175_v12 = vld [vmem:[#allocation5 + $0x18] sm:$0xff]  ;;  %v164_v26 = vand.u32 127, %v163_v24  ;;  %s351_s21 = sshll.u32 %s543_s20, 4  ;;  %s352_s21 = int_to_ptr.vmem [resolvable:$true] %s351_s21 }
  0x29   :  { %392 = vmatprep.subr.mxu0 %v540_v0  ;;  %400 = vmatpush3.msra.mxu1 %v179_v5  ;;  %v177_v10 = vld [vmem:[#allocation5 + $0x28] sm:$0xff]  ;;  %447 = vlog2.f32 %v69_v7  ;;  %v174_v16 = vld [vmem:[#allocation5 + $0x10] sm:$0xff]  ;;  %v172_v18 = vld [vmem:[#allocation5] sm:$0xff]  ;;  %s509_s22 = scalar_lea.vmem %s352_s21, 128  ;;  %p514_p2 = scmp.lt.s32.totalorder %s352_s21, %s352_s21 }
  0x2a   :  { %393 = vmatpush3.msra.mxu0 %v75_v3  ;;  %401 = vmatprep.subr.mxu1 %v540_v0  ;;  %v173_v17 = vld [vmem:[#allocation5 + $0x8] sm:$0xff]  ;;  %v270_v19 = vld [vmem:[#allocation7 + $0x38] sm:$0xff]  ;;  %v269_v20 = vld [vmem:[#allocation7 + $0x30] sm:$0xff]  ;;  %vm165_vm3 = vcmp.eq.s32.totalorder %v164_v26, 63  ;;  %p510_p1 = scmp.ne.s32.totalorder %s352_s21, %s509_s22  ;;  %p515_p3 = scmp.lt.s32.totalorder %s509_s22, %s509_s22 }
  0x2b   :  { %394 = vmatprep.subr.mxu0 %v540_v0  ;;  %402 = vmatpush3.msra.mxu1 %v178_v8  ;;  %v268_v21 = vld [vmem:[#allocation7 + $0x28] sm:$0xff]  ;;  %v267_v22 = vld [vmem:[#allocation7 + $0x20] sm:$0xff]  ;;  %v266_v23 = vld [vmem:[#allocation7 + $0x18] sm:$0xff] }
  0x2c   :  { %395 = vmatpush3.msra.mxu0 %v74_v6  ;;  %403 = vmatprep.subr.mxu1 %v540_v0  ;;  %v362_v25 = vld [vmem:[%s641_s3] ss:$0 sm:$0xff]  ;;  %v265_v33 = vld [vmem:[#allocation7 + $0x10] sm:$0xff]  ;;  %v263_v35 = vld [vmem:[#allocation7] sm:$0xff]  ;;  %p516_p4 = por %p515_p3, %p514_p2 }
  0x2d   :  { %397 = vmatmul.mubr.msk.f32.vlgmr.msra.gmra.mxu0 %vm84_vm2, %v73_v9  ;;  %404 = vmatpush3.msra.mxu1 %v177_v10  ;;  %v264_v34 = vld [vmem:[#allocation7 + $0x8] sm:$0xff] }
  0x2e   :  { %405 = vmatprep.subr.mxu1 %v540_v0  ;;  %418 = vmatprep.subr.mxu0 %v540_v0  ;;  %v365_v36 = vld [vmem:[%s643_s5] ss:$0 sm:$0xff]  ;;  %p517_p5 = pnand %p516_p4, %p510_p1 }
  0x2f   :  { %406 = vmatpush3.msra.mxu1 %v176_v11  ;;  %434 = vmatprep.mubr.msk.f32.mxu0 %vm541_vm0, %v540_v0 }
  0x30   :  { %407 = vmatprep.subr.mxu1 %v540_v0  ;;  %419 = vmatpush3.msra.mxu0 %v270_v19 }
  0x31   :  { %408 = vmatpush3.msra.mxu1 %v175_v12  ;;  %420 = vmatprep.subr.mxu0 %v540_v0 }
  0x32   :  { %409 = vmatprep.subr.mxu1 %v540_v0  ;;  %421 = vmatpush3.msra.mxu0 %v269_v20 }
  0x33   :  { %410 = vmatpush3.msra.mxu1 %v174_v16  ;;  %422 = vmatprep.subr.mxu0 %v540_v0 }
  0x34   :  { %411 = vmatprep.subr.mxu1 %v540_v0  ;;  %423 = vmatpush3.msra.mxu0 %v268_v21 }
  0x35   :  { %412 = vmatpush3.msra.mxu1 %v173_v17  ;;  %424 = vmatprep.subr.mxu0 %v540_v0 }
  0x36   :  { %v448_v13 = vpop.eup %447  ;;  %413 = vmatprep.subr.mxu1 %v540_v0  ;;  %425 = vmatpush3.msra.mxu0 %v267_v22 }
  0x37   :  { %v71_v14 = vmul.f32 0.6931472, %v448_v13  ;;  %414 = vmatpush3.msra.mxu1 %v172_v18  ;;  %426 = vmatprep.subr.mxu0 %v540_v0 }
  0x38   :  { %427 = vmatpush3.msra.mxu0 %v266_v23 }
  0x39   :  { %v361_v15 = vadd.f32 -9.0, %v71_v14  ;;  %428 = vmatprep.subr.mxu0 %v540_v0 }
  0x3a   :  { %429 = vmatpush3.msra.mxu0 %v265_v33 }
  0x3b   :  { %168 = vperm.xlu0 %446, %v361_v15   ;;  %430 = vmatprep.subr.mxu0 %v540_v0 }
  0x3c   :  { %431 = vmatpush3.msra.mxu0 %v264_v34 }
  0x3d   :  { %432 = vmatprep.subr.mxu0 %v540_v0 }
  0x3e   :  { %433 = vmatpush3.msra.mxu0 %v263_v35 }
  0xb6   :  { %v169_v30 = vpop.permute.xlu0 %168 }
  0xed   :  { %v158_v27 = vpop.f32.mrf.mxu0 }
  0xee   :  { %v159_v28 = vadd.f32 %v362_v25, %v158_v27 }
  0xef   :  { %v398_v29 = vpop.f32.mrf.mxu0 }
  0xf0   :  { %v162_v31 = vmax.f32 %v159_v28, 0.0 }
  0xf2   :  { %v171_v32 = vsel %vm165_vm3, %v169_v30, %v162_v31 }
  0xf3   :  { %416 = vmatmul.mubr.msk.f32.vlgmr.msra.gmra.mxu1 %vm187_vm4, %v171_v32 }
 0x1b3   :  { %v257_v37 = vpop.f32.mrf.mxu1 }
 0x1b4   :  { %v258_v38 = vadd.f32 %v365_v36, %v257_v37 }
 0x1b5   :  { %v417_v39 = vpop.f32.mrf.mxu1 }
 0x1b6   :  { %v261_v40 = vmax.f32 %v258_v38, 0.0 }
 0x1b8   :  { %v262_v41 = vsel %vm165_vm3, %v169_v30, %v261_v40 }
 0x1b9   :  { %435 = vmatmul.mubr.msk.f32.vlgmr.msra.gmra.mxu0 %vm187_vm4, %v262_v41 }
 0x279   :  { %v340_v42 = vpop.f32.mrf.mxu0 }
 0x27a   :  { %344 = vst.msk [vmem:[#allocation8] sm:$0xff] %vm187_vm4, %v340_v42 }
 0x27b   :  { %v436_v43 = vpop.f32.mrf.mxu0 }
 0x27c   :  { %520 = shalt.err (!%p517_p5)
}
 0x27d   :  { %354 = dma.vmem_to_hbm [thread:$0]  %s352_s21, 128, %s645_s7, [#allocation4]  }
 0x27e   :  { %533 = dma.done.wait [#allocation4], 128  }
 0x27f   :  { %534 = vsyncadd [#allocation4], 4294967168 }
 0x280   :  { %358 = vsyncpa [#allocation3], 1 }
 0x281   :  { %359 = vsyncpa [#allocation6], 1 }
 0x282   :  { %360 = vsyncpa [#allocation4], 1 }

</bundles_post_ra>
